<compile_context>
chip_gen: v5e
topology: v5e:2x2
jax: 0.10.0
libtpu: 0.0.40
codegen_flags: <defaults>
</compile_context>

<pallas_src>
import functools

import numpy as np
import jax
import jax.numpy as jnp
from jax.experimental import pallas as pl
from jax.experimental.pallas import tpu as pltpu

LANE = 128  # TPU lane width; packed output rows are exactly one lane group.


# ----------------------------- Pallas kernel -------------------------------

def _conv_mm_kernel(p_ref, w_ref, o_ref, *, negval):
    # p_ref: (tm, G*9*Cin) pixel-packed im2col rows
    # w_ref: (G*9*Cin, 128) block-diagonal (per-pixel) weight matrix
    acc = jnp.dot(p_ref[...], w_ref[...], preferred_element_type=jnp.float32)
    if negval is not None:  # fused LeakyReLU(negative_slope=negval), in f32
        acc = jnp.where(acc >= 0.0, acc, jnp.float32(negval) * acc)
    o_ref[...] = acc.astype(o_ref.dtype)


# ----------------------------- tile selection -------------------------------

@functools.lru_cache(maxsize=1)
def _num_tensorcores():
    """Best-effort TensorCore count per chip (v7x=2, v5e/v6e=1)."""
    try:
        info = pltpu.get_tpu_info()
        for name in ("num_cores", "num_tensorcores", "tensor_cores",
                     "cores_per_chip", "core_count"):
            v = getattr(info, name, None)
            if isinstance(v, int) and v > 0:
                return v
    except Exception:
        pass
    try:
        v = getattr(jax.devices()[0], "num_cores", None)
        if isinstance(v, int) and v > 0:
            return v
    except Exception:
        pass
    # Conservative fallback: assume dual-TC; the >=512-row gate below prevents
    # pointless splits of small problems on single-core parts anyway.
    return 2


def _pick_tm(mg, lhs_row_bytes, out_row_bytes, weight_bytes,
             target=2048, min_split_rows=512, vmem_budget=20 * 1024 * 1024):
    """Packed-row tile size.

    * As large as fits the VMEM budget (double-buffered LHS + output tiles,
      double-buffered resident weights), capped at `target` packed rows.
    * Never force a split for small problems; only split across TensorCores
      when every grid step still gets >= min_split_rows packed rows.
    `mg` is always a multiple of 8 (padded by the caller).
    """
    per_row = 2 * (lhs_row_bytes + out_row_bytes)          # double-buffered
    avail = vmem_budget - 2 * weight_bytes
    cap = target
    if avail > per_row * 8:
        cap = min(cap, max(8, (avail // per_row) // 8 * 8))
    else:
        cap = 8
    ncores = _num_tensorcores()
    if ncores > 1 and mg >= ncores * min_split_rows:
        per_core = -(-mg // ncores)                        # ceil
        cap = min(cap, max(8, -(-per_core // 8) * 8))
    if mg <= cap:
        return mg          # single step; mg equals the full (8-aligned) dim
    return cap


# ----------------------------- conv3x3 wrapper ------------------------------

def conv3x3_pallas(x_nhwc, layer, stride, negval=None,
                   dot_dtype=jnp.bfloat16, out_dtype=jnp.float32,
                   tm_target=2048):
    """Conv2d(k=3, padding=1, bias=False) [+ fused LeakyReLU] via Pallas."""
    B, H, W, Cin = x_nhwc.shape
    k = 9 * Cin
    group, cout = layer["group"], layer["cout"]
    assert layer["k"] == k, (layer["k"], k)
    w_pack = layer["w"].astype(dot_dtype)
    GK, N = w_pack.shape                      # GK = group*k, N = 128-padded
    Ho = (H + 2 - 3) // stride + 1
    Wo = (W + 2 - 3) // stride + 1
    M = B * Ho * Wo

    # ---- glue: zero-pad + im2col, tap order (ky, kx, cin) ----
    # TODO(synk): move this into the kernel with a row-band halo DMA
    # (memory_space=pl.ANY) to kill the patch-matrix HBM round trip.
    xp = jnp.pad(x_nhwc, ((0, 0), (1, 1), (1, 1), (0, 0)))
    taps = [xp[:, ky:ky + stride * (Ho - 1) + 1:stride,
                  kx:kx + stride * (Wo - 1) + 1:stride, :]
            for ky in range(3) for kx in range(3)]
    patches = jnp.concatenate(taps, axis=-1).reshape(M, k).astype(dot_dtype)

    # ---- pixel packing: `group` consecutive pixels per 128-lane output row --
    mg = -(-M // group)
    mg = -(-mg // 8) * 8                      # keep packed-row dim 8-aligned
    m_pad = mg * group
    if m_pad > M:
        patches = jnp.pad(patches, ((0, m_pad - M), (0, 0)))
    lhs = patches.reshape(mg, GK)

    itm = jnp.dtype(dot_dtype).itemsize
    oitm = jnp.dtype(out_dtype).itemsize
    cost = pl.CostEstimate(                   # real work, not padded-lane work
        flops=2 * M * k * cout,
        transcendentals=0,
        bytes_accessed=M * k * itm + GK * N * itm + M * cout * oitm)

    tm = _pick_tm(mg, GK * itm, N * oitm, GK * N * itm, target=tm_target)
    grid = (pl.cdiv(mg, tm),)

    out = pl.pallas_call(
        functools.partial(_conv_mm_kernel, negval=negval),
        out_shape=jax.ShapeDtypeStruct((mg, N), out_dtype),
        grid=grid,
        in_specs=[
            pl.BlockSpec((tm, GK), lambda i: (i, 0)),   # packed im2col rows
            pl.BlockSpec((GK, N), lambda i: (0, 0)),    # weights, resident
        ],
        out_specs=pl.BlockSpec((tm, N), lambda i: (i, 0)),  # lane-dense, real
        compiler_params=pltpu.CompilerParams(
            dimension_semantics=("parallel",),
            vmem_limit_bytes=32 * 1024 * 1024),
        cost_estimate=cost,
    )(lhs, w_pack)

    # Unpack: (mg, group*cout [+pad]) -> (M, cout) -> NHWC.  For the n_feats
    # layers group*cout == 128, so the lane slice is a no-op.
    out = out[:, :group * cout].reshape(m_pad, cout)[:M]
    return out.reshape(B, Ho, Wo, cout)


# ------------------------------ DownBlock -----------------------------------

def init_downblock_params(key, scale, n_colors, n_feats):
    """Conv weights matching DownBlock.__init__ (all bias=False), OIHW."""
    shapes = [(n_feats, n_colors, 3, 3)]
    for _ in range(1, int(np.log2(scale))):
        shapes.append((n_feats, n_feats, 3, 3))
    shapes.append((n_colors, n_feats, 3, 3))
    weights = []
    for s in shapes:
        key, sub = jax.random.split(key)
        weights.append(0.1 * jax.random.normal(sub, s, dtype=jnp.float32))
    return weights


def prepare_downblock_weights(weights):
    """Done ONCE at init.

    (Cout,Cin,3,3) OIHW -> block-diagonal pixel-packed matmul weight:
      rows   = group * 9 * Cin   (group = 128 // Cout pixels per output row)
      cols   = 128               (group*Cout real lanes, rest zero)
      block (p,p) = (9*Cin, Cout) matrix in (ky, kx, cin) tap order.
    """
    prepared = []
    for w in weights:
        w_np = np.asarray(w)
        cout, cin = int(w_np.shape[0]), int(w_np.shape[1])
        k = 9 * cin
        w_mat = w_np.transpose(2, 3, 1, 0).reshape(k, cout)   # (ky,kx,cin) x co
        group = max(1, LANE // cout)
        n = ((group * cout + LANE - 1) // LANE) * LANE
        pack = np.zeros((group * k, n), np.float32)
        for p in range(group):
            pack[p * k:(p + 1) * k, p * cout:(p + 1) * cout] = w_mat
        prepared.append(dict(w=jnp.asarray(pack), cout=cout, group=group, k=k))
    return prepared


def downblock_forward(x_nchw, prepared, negval, dot_dtype=jnp.bfloat16):
    """Exact DownBlock forward: [conv(s=2)+LeakyReLU] * log2(scale), conv(s=1).

    Intermediate activations are stored in dot_dtype (bf16 recommended on all
    TPU generations, incl. v5e); accumulation/LeakyReLU are f32 in-kernel and
    the final layer output is f32.
    """
    x = jnp.transpose(x_nchw, (0, 2, 3, 1))  # NCHW -> NHWC
    n = len(prepared)
    for i, layer in enumerate(prepared):
        last = (i == n - 1)
        x = conv3x3_pallas(
            x, layer,
            stride=1 if last else 2,
            negval=None if last else negval,
            dot_dtype=dot_dtype,
            out_dtype=jnp.float32 if last else dot_dtype)
    return jnp.transpose(x, (0, 3, 1, 2))  # NHWC -> NCHW


# ------------------------------ reference -----------------------------------

def downblock_forward_ref(x_nchw, weights, negval):
    x = x_nchw
    n = len(weights)
    for i, w in enumerate(weights):
        stride = 2 if i < n - 1 else 1
        x = jax.lax.conv_general_dilated(
            x, w, (stride, stride), ((1, 1), (1, 1)),
            dimension_numbers=("NCHW", "OIHW", "NCHW"),
            precision=jax.lax.Precision.HIGHEST)
        if i < n - 1:
            x = jnp.where(x >= 0.0, x, negval * x)
    return x


# --------------------------------- main --------------------------------------

if __name__ == "__main__":
    # Small synthetic config (mimics `opt`): n_colors=3, n_feats=16, negval=0.2
    # scale=4 -> two stride-2 conv+LeakyReLU stages + final stride-1 conv.
    scale = 4
    n_colors, n_feats, negval = 3, 16, 0.2
    B, H, W = 2, 16, 16

    key = jax.random.PRNGKey(0)
    key, kx = jax.random.split(key)
    x = jax.random.normal(kx, (B, n_colors, H, W), dtype=jnp.float32)
    weights = init_downblock_params(key, scale, n_colors, n_feats)
    prepared = prepare_downblock_weights(weights)   # packed matmul weights, once

    ref = jax.block_until_ready(downblock_forward_ref(x, weights, negval))

    # f32 matmul-input path (f32 intermediates).
    out_f32 = jax.block_until_ready(
        downblock_forward(x, prepared, negval, dot_dtype=jnp.float32))
    assert out_f32.shape == ref.shape, (out_f32.shape, ref.shape)
    assert np.allclose(np.asarray(out_f32), np.asarray(ref), rtol=1e-2, atol=1e-2)

    # bf16 path (default on all generations): bf16 matmul inputs AND bf16
    # intermediate activations; f32 accumulate/LeakyReLU; f32 final output.
    out_bf16 = jax.block_until_ready(
        downblock_forward(x, prepared, negval, dot_dtype=jnp.bfloat16))
    assert out_bf16.shape == ref.shape, (out_bf16.shape, ref.shape)
    assert np.allclose(np.asarray(out_bf16), np.asarray(ref), rtol=3e-2, atol=3e-2)

    print("KERNEL_OK")
</pallas_src>

<mosaic_0001>
module attributes {stable_mosaic.version = 11 : i64} {
  func.func @_conv_mm_kernel(%arg0: i32, %arg1: memref<16x216xf32, #tpu.memory_space<vmem>>, %arg2: memref<216x128xf32, #tpu.memory_space<vmem>>, %arg3: memref<16x128xf32, #tpu.memory_space<vmem>>) attributes {dimension_semantics = [#tpu.dimension_semantics<parallel>], iteration_bounds = array<i64: 1>, scalar_prefetch = 0 : i64, scratch_operands = 0 : i64, tpu.core_type = #tpu.core_type<tc>, window_params = [{transform_indices = @transform_0, window_bounds = array<i64: 16, 216>}, {pipeline_mode = #tpu.pipeline_mode<synchronous>, transform_indices = @transform_1, window_bounds = array<i64: 216, 128>}, {transform_indices = @transform_2, window_bounds = array<i64: 16, 128>}]} {
    %c0 = arith.constant 0 : index
    %c0_0 = arith.constant 0 : index
    %0 = vector.load %arg1[%c0, %c0_0] : memref<16x216xf32, #tpu.memory_space<vmem>>, vector<16x216xf32>
    %c0_1 = arith.constant 0 : index
    %c0_2 = arith.constant 0 : index
    %1 = vector.load %arg2[%c0_1, %c0_2] : memref<216x128xf32, #tpu.memory_space<vmem>>, vector<216x128xf32>
    %cst = arith.constant dense<0.000000e+00> : vector<16x128xf32>
    %2 = tpu.matmul %0, %1, %cst {dimension_numbers = #tpu.dot_dimension_numbers<[1], [0], [0], [1], [0, 0, 1, 1], [], []>} : vector<16x216xf32>, vector<216x128xf32>, vector<16x128xf32> -> vector<16x128xf32>
    %cst_3 = arith.constant 0.000000e+00 : f32
    %3 = vector.broadcast %cst_3 : f32 to vector<16x128xf32>
    %4 = arith.cmpf oge, %2, %3 : vector<16x128xf32>
    %cst_4 = arith.constant 2.000000e-01 : f32
    %5 = vector.broadcast %cst_4 : f32 to vector<16x128xf32>
    %6 = arith.mulf %5, %2 : vector<16x128xf32>
    %7 = arith.select %4, %2, %6 : vector<16x128xi1>, vector<16x128xf32>
    %c0_5 = arith.constant 0 : index
    %c0_6 = arith.constant 0 : index
    %8 = vector.load %arg3[%c0_5, %c0_6] : memref<16x128xf32, #tpu.memory_space<vmem>>, vector<16x128xf32>
    tpu.vector_store %arg3[%c0_5, %c0_6], %7 {strides = array<i32>} : memref<16x128xf32, #tpu.memory_space<vmem>>, vector<16x128xf32>,
    return
  }
  func.func @transform_0(%arg0: i32) -> (i32, i32) {
    %c0_i32 = arith.constant 0 : i32
    %c0_i32_0 = arith.constant 0 : i32
    return %arg0, %c0_i32 : i32, i32
  }
  func.func @transform_1(%arg0: i32) -> (i32, i32) {
    %c0_i32 = arith.constant 0 : i32
    %c0_i32_0 = arith.constant 0 : i32
    %c0_i32_1 = arith.constant 0 : i32
    return %c0_i32, %c0_i32_0 : i32, i32
  }
  func.func @transform_2(%arg0: i32) -> (i32, i32) {
    %c0_i32 = arith.constant 0 : i32
    %c0_i32_0 = arith.constant 0 : i32
    return %arg0, %c0_i32 : i32, i32
  }
}

</mosaic_0001>

<bundles_post_ra>
// kernel: tpu_custom_call.1
= control target key start
LH: loop header
LB: loop body
LE: loop exit
PB: predicated region body
PF: predicated region fallthrough
CT: control target
= control target key end

     0   :  { %7 = vsyncpa [#allocation3], 0  ;;  %s298_s0 = inlined_call_operand.hbm [shape: f32[16,216], index: 0, kind: input, shape index: {}]   ;;  %s299_s1 = inlined_call_operand.hbm [shape: f32[216,128], index: 1, kind: input, shape index: {}]   ;;  %s300_s2 = inlined_call_operand.hbm [shape: f32[16,128], index: 2, kind: output, shape index: {}]  }
   0x1   :  { %8 = vsyncpa [#allocation6], 0 }
   0x2   :  { %9 = vsyncpa [#allocation4], 0  ;;  %s14_s11 = sshll.u32 %s298_s0, 4  ;;  %s259_s12 = smov [#allocation2]   ;;  %s15_s11 = int_to_ptr.hbm [resolvable:$true] %s14_s11 }
   0x3   :  { %s16_s13 = sshll.u32 %s259_s12, 4  ;;  %s27_s16 = sshll.u32 %s299_s1, 4  ;;  %s17_s13 = int_to_ptr.vmem [resolvable:$true] %s16_s13  ;;  %s28_s16 = int_to_ptr.hbm [resolvable:$true] %s27_s16 }
   0x4   :  { %s260_s17 = smov 256   ;;  %s261_s18 = smov 16  }
   0x5   :  { %22 = dma.hbm_to_vmem [thread:$0]  %s15_s11, 512, %s17_s13, [#allocation3], %s260_s17, %s260_s17, %s261_s18  }
   0x6   :  { %s262_s19 = smov [#allocation5]   ;;  %s263_s21 = smov 128  }
   0x7   :  { %s29_s20 = sshll.u32 %s262_s19, 4  ;;  %s264_s22 = smov 8   ;;  %s30_s20 = int_to_ptr.vmem [resolvable:$true] %s29_s20 }
   0x8   :  { %35 = dma.hbm_to_vmem [thread:$0]  %s28_s16, 3456, %s30_s20, [#allocation6], %s263_s21, %s263_s21, %s264_s22  }
   0x9   :  { %253 = dma.done.wait [#allocation3], 512  }
   0xa   :  { %254 = vsyncadd [#allocation3], 4294966784 }
   0xb   :  { %255 = dma.done.wait [#allocation6], 3456  }
   0xc   :  { %256 = vsyncadd [#allocation6], 4294963840  ;;  %v63_v0 = vld [vmem:[#allocation5 + $0x78] sm:$0xff]  ;;  %v62_v1 = vld [vmem:[#allocation5 + $0x70] sm:$0xff]  ;;  %vm75_vm0 = vcmask 719872   ;;  %s265_s0 = smov [#allocation7]  }
   0xd   :  { %82 = vmatpush.msra.mxu0 %v63_v0  ;;  %158 = vmatpush.msra.mxu2 %v63_v0  ;;  %v74_v2 = vld [vmem:[#allocation5 + $0xd0] sm:$0xff]  ;;  %v61_v3 = vld [vmem:[#allocation5 + $0x68] sm:$0xff]  ;;  %v72_v5 = vld [vmem:[#allocation5 + $0xc0] sm:$0xff]  ;;  %s140_s1 = sshll.u32 %s265_s0, 4  ;;  %s142_s25 = sshll.u32 %s300_s2, 4  ;;  %s141_s1 = int_to_ptr.vmem [resolvable:$true] %s140_s1  ;;  %s143_s25 = int_to_ptr.hbm [resolvable:$true] %s142_s25 }
   0xe   :  { %110 = vmatpush.msra.mxu1 %v74_v2  ;;  %v73_v4 = vld [vmem:[#allocation5 + $0xc8] sm:$0xff]  ;;  %v60_v6 = vld [vmem:[#allocation5 + $0x60] sm:$0xff]  ;;  %v71_v7 = vld [vmem:[#allocation5 + $0xb8] sm:$0xff] }
   0xf   :  { %83 = vmatpush.msra.mxu0 %v62_v1  ;;  %159 = vmatpush.msra.mxu2 %v62_v1  ;;  %v59_v8 = vld [vmem:[#allocation5 + $0x58] sm:$0xff]  ;;  %v70_v9 = vld [vmem:[#allocation5 + $0xb0] sm:$0xff]  ;;  %v69_v11 = vld [vmem:[#allocation5 + $0xa8] sm:$0xff] }
  0x10   :  { %111 = vmatpush.msra.mxu1 %v73_v4  ;;  %v58_v10 = vld [vmem:[#allocation5 + $0x50] sm:$0xff]  ;;  %v57_v12 = vld [vmem:[#allocation5 + $0x48] sm:$0xff]  ;;  %v68_v13 = vld [vmem:[#allocation5 + $0xa0] sm:$0xff] }
  0x11   :  { %84 = vmatpush.msra.mxu0 %v61_v3  ;;  %160 = vmatpush.msra.mxu2 %v61_v3  ;;  %v56_v14 = vld [vmem:[#allocation5 + $0x40] sm:$0xff]  ;;  %v67_v15 = vld [vmem:[#allocation5 + $0x98] sm:$0xff]  ;;  %v66_v17 = vld [vmem:[#allocation5 + $0x90] sm:$0xff] }
  0x12   :  { %112 = vmatpush.msra.mxu1 %v72_v5  ;;  %v55_v16 = vld [vmem:[#allocation5 + $0x38] sm:$0xff]  ;;  %v54_v18 = vld [vmem:[#allocation5 + $0x30] sm:$0xff]  ;;  %v65_v19 = vld [vmem:[#allocation5 + $0x88] sm:$0xff] }
  0x13   :  { %85 = vmatpush.msra.mxu0 %v60_v6  ;;  %161 = vmatpush.msra.mxu2 %v60_v6  ;;  %v53_v20 = vld [vmem:[#allocation5 + $0x28] sm:$0xff]  ;;  %v64_v21 = vld [vmem:[#allocation5 + $0x80] sm:$0xff]  ;;  %v51_v24 = vld [vmem:[#allocation5 + $0x18] sm:$0xff] }
  0x14   :  { %113 = vmatpush.msra.mxu1 %v71_v7  ;;  %v52_v22 = vld [vmem:[#allocation5 + $0x20] sm:$0xff]  ;;  %v45_v23 = vld [vmem:[#allocation2 + $0x8] sm:$0xff]  ;;  %v50_v25 = vld [vmem:[#allocation5 + $0x10] sm:$0xff] }
  0x15   :  { %86 = vmatpush.msra.mxu0 %v59_v8  ;;  %162 = vmatpush.msra.mxu2 %v59_v8  ;;  %v49_v26 = vld [vmem:[#allocation5 + $0x8] sm:$0xff]  ;;  %v48_v27 = vld [vmem:[#allocation5] sm:$0xff]  ;;  %v46_v29 = vld [vmem:[#allocation2 + $0x10] sm:$0xff] }
  0x16   :  { %114 = vmatpush.msra.mxu1 %v70_v9  ;;  %v44_v28 = vld [vmem:[#allocation2] sm:$0xff]  ;;  %v47_v30 = vld [vmem:[#allocation2 + $0x18] sm:$0xff] }
  0x17   :  { %87 = vmatpush.msra.mxu0 %v58_v10  ;;  %163 = vmatpush.msra.mxu2 %v58_v10 }
  0x18   :  { %115 = vmatpush.msra.mxu1 %v69_v11 }
  0x19   :  { %88 = vmatpush.msra.mxu0 %v57_v12  ;;  %164 = vmatpush.msra.mxu2 %v57_v12 }
  0x1a   :  { %116 = vmatpush.msra.mxu1 %v68_v13 }
  0x1b   :  { %89 = vmatpush.msra.mxu0 %v56_v14  ;;  %165 = vmatpush.msra.mxu2 %v56_v14 }
  0x1c   :  { %117 = vmatpush.msra.mxu1 %v67_v15 }
  0x1d   :  { %90 = vmatpush.msra.mxu0 %v55_v16  ;;  %166 = vmatpush.msra.mxu2 %v55_v16 }
  0x1e   :  { %118 = vmatpush.msra.mxu1 %v66_v17 }
  0x1f   :  { %91 = vmatpush.msra.mxu0 %v54_v18  ;;  %167 = vmatpush.msra.mxu2 %v54_v18 }
  0x20   :  { %119 = vmatpush.msra.mxu1 %v65_v19 }
  0x21   :  { %92 = vmatpush.msra.mxu0 %v53_v20  ;;  %168 = vmatpush.msra.mxu2 %v53_v20 }
  0x22   :  { %120 = vmatpush.msra.mxu1 %v64_v21 }
  0x23   :  { %93 = vmatpush.msra.mxu0 %v52_v22  ;;  %169 = vmatpush.msra.mxu2 %v52_v22 }
  0x24   :  { %156 = vmatmul.msk.f32.vlgmr.msra.gmra.mxu1 %vm75_vm0, %v45_v23 }
  0x25   :  { %94 = vmatpush.msra.mxu0 %v51_v24  ;;  %170 = vmatpush.msra.mxu2 %v51_v24 }
  0x27   :  { %95 = vmatpush.msra.mxu0 %v50_v25  ;;  %171 = vmatpush.msra.mxu2 %v50_v25 }
  0x29   :  { %96 = vmatpush.msra.mxu0 %v49_v26  ;;  %172 = vmatpush.msra.mxu2 %v49_v26 }
  0x2b   :  { %97 = vmatpush.msra.mxu0 %v48_v27  ;;  %173 = vmatpush.msra.mxu2 %v48_v27 }
  0x2c   :  { %98 = vmatmul.f32.vlgmr.msra.gmra.mxu0 %v44_v28  ;;  %101 = vmatmul.f32.vlgmr.msra.gmra.mxu2 %v46_v29 }
  0x2d   :  { %157 = vmatmul.msk.f32.gmra.mxu1 %vm75_vm0, %v47_v30 }
  0xa1   :  { %v122_v31 = vpop.f32.mrf.mxu1 }
  0xa9   :  { %v99_v32 = vpop.f32.mrf.mxu0 }
  0xaa   :  { %v123_v33 = vadd.f32 %v122_v31, %v99_v32  ;;  %v125_v35 = vpop.f32.mrf.mxu1 }
  0xac   :  { %vm128_vm1 = vcmp.ge.f32.partialorder %v123_v33, 0.0  ;;  %v130_v34 = vmul.f32 0.2, %v123_v33 }
  0xae   :  { %v132_v36 = vsel %vm128_vm1, %v123_v33, %v130_v34 }
  0xaf   :  { %134 = vst [vmem:[#allocation7] sm:$0xff] %v132_v36  ;;  %v102_v37 = vpop.f32.mrf.mxu2 }
  0xb0   :  { %v126_v38 = vadd.f32 %v125_v35, %v102_v37 }
  0xb2   :  { %vm129_vm2 = vcmp.ge.f32.partialorder %v126_v38, 0.0  ;;  %v131_v39 = vmul.f32 0.2, %v126_v38 }
  0xb4   :  { %v133_v40 = vsel %vm129_vm2, %v126_v38, %v131_v39 }
  0xb5   :  { %135 = vst [vmem:[#allocation7 + $0x8] sm:$0xff] %v133_v40 }
  0xb6   :  { %148 = dma.vmem_to_hbm [thread:$0]  %s141_s1, 256, %s143_s25, [#allocation4], %s263_s21, %s263_s21, %s264_s22  }
  0xb7   :  { %257 = dma.done.wait [#allocation4], 256  }
  0xb8   :  { %258 = vsyncadd [#allocation4], 4294967040 }
  0xb9   :  { %153 = vsyncpa [#allocation3], 1 }
  0xba   :  { %154 = vsyncpa [#allocation6], 1 }
  0xbb   :  { %155 = vsyncpa [#allocation4], 1 }

</bundles_post_ra>
